<compile_context>
chip_gen: v7x
topology: tpu7x:2x2x1
jax: 0.10.0
libtpu: 0.0.40
codegen_flags: <defaults>
</compile_context>

<pallas_src>
import functools

import jax
import jax.numpy as jnp
from jax import lax
from jax.experimental import pallas as pl
from jax.experimental.pallas import tpu as pltpu

LANE = 128
MAX_BLOCK_ROWS = 4096   # (4096, 128) f32 = 2 MiB per input block
ACC_ROWS_PREF = 64      # preferred resident accumulator tile: (64, 128) = 8 vregs


def _tensorcores_per_device() -> int:
    """Best-effort TensorCore count of the local device (gates the megacore split)."""
    try:
        kind = jax.devices()[0].device_kind.lower()
    except Exception:
        return 1
    # Single-TensorCore generations.
    if "lite" in kind or "v5e" in kind or "v6e" in kind or "v2" in kind or "v3" in kind:
        return 1
    # Megacore (v4, v5p) and v7x expose 2 TensorCores per device.
    if "v4" in kind or "v5p" in kind or "7" in kind:
        return 2
    return 1


def _mape_kernel(pred_ref, true_ref, out_ref, *,
                 block_rows, acc_rows, n_inner, first_masked_block,
                 valid_rows, needs_mask):
    c = pl.program_id(0)   # TensorCore / outer-split index
    i = pl.program_id(1)   # streaming (reduction) index

    @pl.when(i == 0)
    def _init():
        out_ref[...] = jnp.zeros_like(out_ref)

    p = pred_ref[...].astype(jnp.float32)
    t = true_ref[...].astype(jnp.float32)

    # EUP approximate reciprocal + one Newton-Raphson refinement (~1e-7 rel err):
    # keeps per-step compute off the exact-divide VALU path while staying far
    # inside the 1e-5 tolerance.  Like the PyTorch module, y_true == 0 makes the
    # whole loss non-finite.
    r = pl.reciprocal(t, approx=True)
    r = r * (2.0 - t * r)
    contrib = jnp.abs((t - p) * r)

    def _accumulate(x):
        if acc_rows == block_rows:
            out_ref[...] += x
        else:
            # (block_rows,128) -> (G, acc_rows, 128), sum over the leading axis:
            # pure cross-vreg VALU adds (no XLU), accumulator stays tiny.
            out_ref[...] += jnp.sum(
                x.reshape(block_rows // acc_rows, acc_rows, LANE), axis=0)

    if needs_mask:
        b = c * n_inner + i                     # logical (unclamped) block index
        is_tail = b >= first_masked_block

        @pl.when(jnp.logical_not(is_tail))
        def _regular():                         # fast path: no mask ops at all
            _accumulate(contrib)

        @pl.when(is_tail)
        def _tail():                            # overhanging / duplicated block
            row = b * block_rows + lax.broadcasted_iota(jnp.int32, contrib.shape, 0)
            # Select (never multiply-by-mask) so inf/nan in padded garbage rows
            # is dropped instead of propagated.
            _accumulate(jnp.where(row < valid_rows, contrib, 0.0))
    else:
        _accumulate(contrib)


def mape_loss(y_pred, y_true):
    """mean(|(y_true - y_pred) / y_true|) * 100 as a scalar float32."""
    assert y_pred.shape == y_true.shape
    total_n = int(y_pred.size)

    flat_p = y_pred.reshape(-1)
    flat_t = y_true.reshape(-1)

    # Ragged tail (< 128 elements) handled with plain jnp instead of jnp.pad
    # (padding would re-materialise both full inputs in HBM).
    # TODO(synk): a fully copy-free ragged bulk would need a manual-DMA 1-D
    # pl.ANY-space ref; the prefix slice below may still copy in that rare case.
    rem = total_n % LANE
    main_n = total_n - rem
    if rem:
        tp = flat_t[main_n:].astype(jnp.float32)
        pp = flat_p[main_n:].astype(jnp.float32)
        tail_sum = jnp.sum(jnp.abs((tp - pp) / tp))
        flat_p = flat_p[:main_n]
        flat_t = flat_t[:main_n]
    else:
        tail_sum = jnp.float32(0.0)

    m_rows = main_n // LANE
    if m_rows == 0:                       # tiny input: nothing for the kernel
        return tail_sum * (100.0 / total_n)

    p2 = flat_p.reshape(m_rows, LANE)
    t2 = flat_t.reshape(m_rows, LANE)

    block_rows = m_rows if m_rows <= MAX_BLOCK_ROWS else MAX_BLOCK_ROWS
    n_blocks = pl.cdiv(m_rows, block_rows)

    # Split across TensorCores only on multi-TC chips and only if there is work
    # for both; on v5e/v6e this stays at 1 (no masking / duplicate-DMA overhead).
    n_tc = _tensorcores_per_device()
    nc = 2 if (n_tc >= 2 and n_blocks >= 2) else 1
    n_inner = pl.cdiv(n_blocks, nc)

    # Small fixed accumulator tile, independent of block_rows.
    if block_rows % ACC_ROWS_PREF == 0:
        acc_rows = ACC_ROWS_PREF
    elif block_rows % 8 == 0:
        acc_rows = 8
    else:
        acc_rows = block_rows

    # Blocks that need row masking: the partially-filled final block (if any)
    # and any clamped duplicate block handed to the second core.
    first_masked_block = n_blocks - 1 if (m_rows % block_rows) else n_blocks
    needs_mask = (nc * n_inner - 1) >= first_masked_block

    def in_index_map(c, i):
        b = c * n_inner + i
        if nc * n_inner != n_blocks:
            # The last core may be handed one block past the end; clamp so the
            # DMA stays in bounds (its contribution is zeroed by the row mask).
            b = jnp.minimum(b, n_blocks - 1)
        return (b, 0)

    kernel = functools.partial(
        _mape_kernel,
        block_rows=block_rows,
        acc_rows=acc_rows,
        n_inner=n_inner,
        first_masked_block=first_masked_block,
        valid_rows=m_rows,
        needs_mask=needs_mask,
    )

    # NOTE: on v7x, if profiling shows only one TensorCore active, flip axis 0 to
    # pltpu.CORE_PARALLEL (grid dim == core count); "parallel" is the portable choice.
    dim_sem = ("parallel", "arbitrary") if nc == 2 else ("arbitrary", "arbitrary")

    partials = pl.pallas_call(
        kernel,
        out_shape=jax.ShapeDtypeStruct((nc * acc_rows, LANE), jnp.float32),
        grid_spec=pltpu.PrefetchScalarGridSpec(
            num_scalar_prefetch=0,
            grid=(nc, n_inner),
            in_specs=[
                pl.BlockSpec((block_rows, LANE), in_index_map),
                pl.BlockSpec((block_rows, LANE), in_index_map),
            ],
            # Output block is the resident accumulator (same block across the
            # inner axis); (acc_rows, 128) is lane-/sublane-aligned.
            out_specs=pl.BlockSpec((acc_rows, LANE), lambda c, i: (c, 0)),
        ),
        compiler_params=pltpu.CompilerParams(dimension_semantics=dim_sem),
    )(p2, t2)

    # Tiny wrapper epilogue: reduce the per-core partial tiles and scale.
    return (jnp.sum(partials) + tail_sum) * (100.0 / total_n)


if __name__ == "__main__":
    key = jax.random.PRNGKey(0)
    k1, k2 = jax.random.split(key)
    # Small example shapes (e.g. a batch of predictions from a GNN head).
    shape = (2, 4, 16, 16)
    y_true = jax.random.uniform(k1, shape, jnp.float32, minval=0.5, maxval=2.0)
    y_pred = y_true + 0.1 * jax.random.normal(k2, shape, jnp.float32)

    loss = mape_loss(y_pred, y_true)
    jax.block_until_ready(loss)

    ref = jnp.mean(jnp.abs((y_true - y_pred) / y_true)) * 100.0
    assert jnp.allclose(loss, ref, rtol=1e-5, atol=1e-5), (loss, ref)
    print("KERNEL_OK")
</pallas_src>

<mosaic_0001>
module attributes {stable_mosaic.version = 11 : i64} {
  func.func @_mape_kernel(%arg0: i32, %arg1: i32, %arg2: memref<16x128xf32, #tpu.memory_space<vmem>>, %arg3: memref<16x128xf32, #tpu.memory_space<vmem>>, %arg4: memref<8x128xf32, #tpu.memory_space<vmem>>) attributes {dimension_semantics = [#tpu.dimension_semantics<arbitrary>, #tpu.dimension_semantics<arbitrary>], iteration_bounds = array<i64: 1, 1>, scalar_prefetch = 0 : i64, scratch_operands = 0 : i64, tpu.core_type = #tpu.core_type<tc>, window_params = [{transform_indices = @transform_0, window_bounds = array<i64: 16, 128>}, {transform_indices = @transform_1, window_bounds = array<i64: 16, 128>}, {transform_indices = @transform_2, window_bounds = array<i64: 8, 128>}]} {
    %c0_i32 = arith.constant 0 : i32
    %0 = arith.cmpi eq, %arg1, %c0_i32 : i32
    %1 = arith.extui %0 : i1 to i32
    %c0_i32_0 = arith.constant 0 : i32
    %2 = arith.cmpi ne, %1, %c0_i32_0 : i32
    scf.if %2 {
      %cst_9 = arith.constant 0.000000e+00 : f32
      %18 = vector.broadcast %cst_9 : f32 to vector<8x128xf32>
      %c0_10 = arith.constant 0 : index
      %c0_11 = arith.constant 0 : index
      %19 = vector.load %arg4[%c0_10, %c0_11] : memref<8x128xf32, #tpu.memory_space<vmem>>, vector<8x128xf32>
      tpu.vector_store %arg4[%c0_10, %c0_11], %18 {strides = array<i32>} : memref<8x128xf32, #tpu.memory_space<vmem>>, vector<8x128xf32>,
    } else {
    }
    %c0 = arith.constant 0 : index
    %c0_1 = arith.constant 0 : index
    %3 = vector.load %arg2[%c0, %c0_1] : memref<16x128xf32, #tpu.memory_space<vmem>>, vector<16x128xf32>
    %c0_2 = arith.constant 0 : index
    %c0_3 = arith.constant 0 : index
    %4 = vector.load %arg3[%c0_2, %c0_3] : memref<16x128xf32, #tpu.memory_space<vmem>>, vector<16x128xf32>
    %5 = tpu.reciprocal %4 {approx = true} : vector<16x128xf32> -> vector<16x128xf32>
    %6 = arith.mulf %4, %5 : vector<16x128xf32>
    %cst = arith.constant 2.000000e+00 : f32
    %7 = vector.broadcast %cst : f32 to vector<16x128xf32>
    %8 = arith.subf %7, %6 : vector<16x128xf32>
    %9 = arith.mulf %5, %8 : vector<16x128xf32>
    %10 = arith.subf %4, %3 : vector<16x128xf32>
    %11 = arith.mulf %10, %9 : vector<16x128xf32>
    %12 = math.absf %11 : vector<16x128xf32>
    %c0_4 = arith.constant 0 : index
    %c0_5 = arith.constant 0 : index
    %13 = vector.load %arg4[%c0_4, %c0_5] : memref<8x128xf32, #tpu.memory_space<vmem>>, vector<8x128xf32>
    %14 = vector.shape_cast %12 : vector<16x128xf32> to vector<2x8x128xf32>
    %cst_6 = arith.constant dense<0.000000e+00> : vector<8x128xf32>
    %15 = vector.multi_reduction <add>, %14, %cst_6 [0] : vector<2x8x128xf32> to vector<8x128xf32>
    %16 = arith.addf %13, %15 : vector<8x128xf32>
    %c0_7 = arith.constant 0 : index
    %c0_8 = arith.constant 0 : index
    %17 = vector.load %arg4[%c0_7, %c0_8] : memref<8x128xf32, #tpu.memory_space<vmem>>, vector<8x128xf32>
    tpu.vector_store %arg4[%c0_7, %c0_8], %16 {strides = array<i32>} : memref<8x128xf32, #tpu.memory_space<vmem>>, vector<8x128xf32>,
    return
  }
  func.func @transform_0(%arg0: i32, %arg1: i32) -> (i32, i32) {
    %c1_i32 = arith.constant 1 : i32
    %0 = arith.muli %arg0, %c1_i32 : i32
    %1 = arith.addi %0, %arg1 : i32
    %c0_i32 = arith.constant 0 : i32
    %c0_i32_0 = arith.constant 0 : i32
    return %1, %c0_i32 : i32, i32
  }
  func.func @transform_1(%arg0: i32, %arg1: i32) -> (i32, i32) {
    %c1_i32 = arith.constant 1 : i32
    %0 = arith.muli %arg0, %c1_i32 : i32
    %1 = arith.addi %0, %arg1 : i32
    %c0_i32 = arith.constant 0 : i32
    %c0_i32_0 = arith.constant 0 : i32
    return %1, %c0_i32 : i32, i32
  }
  func.func @transform_2(%arg0: i32, %arg1: i32) -> (i32, i32) {
    %c0_i32 = arith.constant 0 : i32
    %c0_i32_0 = arith.constant 0 : i32
    return %arg0, %c0_i32 : i32, i32
  }
}

</mosaic_0001>

<bundles_post_ra>
// kernel: tpu_custom_call.1
= control target key start
LH: loop header
LB: loop body
LE: loop exit
PB: predicated region body
PF: predicated region fallthrough
CT: control target
= control target key end

     0   :  { %7 = vsyncpa [#allocation3], 0  ;;  %s233_s0 = inlined_call_operand.hbm [shape: f32[16,128], index: 0, kind: input, shape index: {}]   ;;  %s234_s1 = inlined_call_operand.hbm [shape: f32[16,128], index: 1, kind: input, shape index: {}]   ;;  %s235_s2 = inlined_call_operand.hbm [shape: f32[8,128], index: 2, kind: output, shape index: {}]  }
   0x1   :  { %8 = vsyncpa [#allocation6], 0 }
   0x2   :  { %9 = vsyncpa [#allocation4], 0  ;;  %s177_s9 = smov [#allocation2]   ;;  %s105_s13 = scalar_lea.hbm %s233_s0, 256 }
   0x3   :  { %s19_s10 = sshll.u32 %s177_s9, 4  ;;  %p106_p0 = scmp.ne.s32.totalorder %s233_s0, %s105_s13  ;;  %s20_s10 = int_to_ptr.vmem [resolvable:$true] %s19_s10 }
   0x4   :  { %p109_p1 = scmp.lt.u32.totalorder %s105_s13, %s233_s0 }
   0x6   :  { %p111_p2 = pnand %p109_p1, %p106_p0 }
   0x8   :  { %114 = shalt.err (!%p111_p2)
}
   0x9   :  { %s115_s18 = scalar_lea.vmem %s20_s10, 256  ;;  %p120_p4 = scmp.lt.s32.totalorder %s20_s10, %s20_s10 }
   0xa   :  { %p116_p3 = scmp.ne.s32.totalorder %s20_s10, %s115_s18  ;;  %p121_p5 = scmp.lt.s32.totalorder %s115_s18, %s115_s18 }
   0xc   :  { %p122_p6 = por %p121_p5, %p120_p4 }
   0xe   :  { %p123_p7 = pnand %p122_p6, %p116_p3 }
  0x10   :  { %126 = shalt.err (!%p123_p7)
}
  0x11   :  { %s178_s19 = smov 128   ;;  %s179_s20 = smov 8  }
  0x12   :  { %25 = dma.hbm_to_vmem [thread:$0]  %s233_s0, 256, %s20_s10, [#allocation3], %s178_s19, %s178_s19, %s179_s20  }
  0x13   :  { %s180_s23 = smov [#allocation5]   ;;  %s127_s27 = scalar_lea.hbm %s234_s1, 256 }
  0x14   :  { %s35_s24 = sshll.u32 %s180_s23, 4  ;;  %p128_p8 = scmp.ne.s32.totalorder %s234_s1, %s127_s27  ;;  %s36_s24 = int_to_ptr.vmem [resolvable:$true] %s35_s24 }
  0x15   :  { %p131_p9 = scmp.lt.u32.totalorder %s127_s27, %s234_s1 }
  0x17   :  { %p133_p10 = pnand %p131_p9, %p128_p8 }
  0x19   :  { %136 = shalt.err (!%p133_p10)
}
  0x1a   :  { %s137_s4 = scalar_lea.vmem %s36_s24, 256  ;;  %p142_p12 = scmp.lt.s32.totalorder %s36_s24, %s36_s24 }
  0x1b   :  { %p138_p11 = scmp.ne.s32.totalorder %s36_s24, %s137_s4  ;;  %p143_p13 = scmp.lt.s32.totalorder %s137_s4, %s137_s4 }
  0x1d   :  { %p144_p0 = por %p143_p13, %p142_p12 }
  0x1f   :  { %p145_p1 = pnand %p144_p0, %p138_p11 }
  0x21   :  { %148 = shalt.err (!%p145_p1)
}
  0x22   :  { %41 = dma.hbm_to_vmem [thread:$0]  %s234_s1, 256, %s36_s24, [#allocation6], %s178_s19, %s178_s19, %s179_s20  }
  0x23   :  { %171 = dma.done.wait [#allocation3], 256  }
  0x24   :  { %172 = vsyncadd [#allocation3], 4294967040 }
  0x25   :  { %173 = dma.done.wait [#allocation6], 256  }
  0x26   :  { %174 = vsyncadd [#allocation6], 4294967040  ;;  %v59_v0 = vld [vmem:[#allocation5] sm:$0xff]  ;;  %v60_v1 = vld [vmem:[#allocation5 + $0x8] sm:$0xff]  ;;  %s181_s1 = smov [#allocation7]  }
  0x27   :  { %101 = vrcp.f32 %v59_v0  ;;  %v57_v3 = vld [vmem:[#allocation2] sm:$0xff]  ;;  %v58_v5 = vld [vmem:[#allocation2 + $0x8] sm:$0xff]  ;;  %s85_s6 = sshll.u32 %s181_s1, 4  ;;  %s86_s6 = int_to_ptr.vmem [resolvable:$true] %s85_s6 }
  0x28   :  { %103 = vrcp.f32 %v60_v1  ;;  %v69_v9 = vsub.f32 %v59_v0, %v57_v3  ;;  %v70_v11 = vsub.f32 %v60_v1, %v58_v5  ;;  %s149_s7 = scalar_lea.vmem %s86_s6, 128  ;;  %p154_p3 = scmp.lt.s32.totalorder %s86_s6, %s86_s6 }
  0x29   :  { %p150_p2 = scmp.ne.s32.totalorder %s86_s6, %s149_s7  ;;  %p155_p4 = scmp.lt.s32.totalorder %s149_s7, %s149_s7 }
  0x2b   :  { %p156_p5 = por %p155_p4, %p154_p3 }
  0x2d   :  { %p157_p6 = pnand %p156_p5, %p150_p2 }
  0x31   :  { %v102_v2 = vpop.eup %101 }
  0x32   :  { %v104_v4 = vpop.eup %103  ;;  %v63_v6 = vmul.f32 %v102_v2, %v59_v0 }
  0x33   :  { %v64_v7 = vmul.f32 %v104_v4, %v60_v1 }
  0x34   :  { %v65_v8 = vsub.f32 2.0, %v63_v6 }
  0x35   :  { %v66_v10 = vsub.f32 2.0, %v64_v7 }
  0x36   :  { %v67_v12 = vmul.f32 %v102_v2, %v65_v8 }
  0x37   :  { %v68_v13 = vmul.f32 %v104_v4, %v66_v10 }
  0x38   :  { %v71_v14 = vmul.f32 %v69_v9, %v67_v12 }
  0x39   :  { %v72_v15 = vmul.f32 %v70_v11, %v68_v13 }
  0x3a   :  { %v73_v16 = vand.u32 2147483647, %v71_v14 }
  0x3b   :  { %v74_v17 = vand.u32 2147483647, %v72_v15 }
  0x3d   :  { %v76_v18 = vadd.f32 %v74_v17, %v73_v16 }
  0x3f   :  { %78 = vst [vmem:[#allocation7] sm:$0xff] %v76_v18 }
  0x40   :  { %160 = shalt.err (!%p157_p6)
}
  0x41   :  { %s161_s10 = scalar_lea.hbm %s235_s2, 128 }
  0x42   :  { %p162_p7 = scmp.ne.s32.totalorder %s235_s2, %s161_s10  ;;  %p165_p8 = scmp.lt.u32.totalorder %s161_s10, %s235_s2 }
  0x44   :  { %p167_p9 = pnand %p165_p8, %p162_p7 }
  0x46   :  { %170 = shalt.err (!%p167_p9)
}
  0x47   :  { %88 = dma.vmem_to_hbm [thread:$0]  %s86_s6, 128, %s235_s2, [#allocation4]  }
  0x48   :  { %175 = dma.done.wait [#allocation4], 128  }
  0x49   :  { %176 = vsyncadd [#allocation4], 4294967168 }
  0x4a   :  { %92 = vsyncpa [#allocation3], 1 }
  0x4b   :  { %93 = vsyncpa [#allocation6], 1 }
  0x4c   :  { %94 = vsyncpa [#allocation4], 1 }

</bundles_post_ra>
